<compile_context>
chip_gen: v6e
topology: v6e:2x2x1
jax: 0.10.0
libtpu: 0.0.40
codegen_flags: <defaults>
</compile_context>

<pallas_src>
import jax
import jax.numpy as jnp
import numpy as np
from jax.experimental import pallas as pl
from jax.experimental.pallas import tpu as pltpu


# ----------------------------- Pallas kernel ------------------------------

def se_layer_kernel(x_ref, wt_ref, b_ref, o_ref):
    # x_ref  : (bb, C, T) input block in its native dtype (f32/bf16), T lane-dense
    # wt_ref : (C, C)     1x1-conv weight, pre-transposed to (C_in, C_out), f32
    # b_ref  : (1, C)     conv bias, f32
    # o_ref  : (bb, C, T) gated output block (same dtype as x)
    t = x_ref.shape[2]
    inv_t = jnp.float32(1.0 / t)          # block T == full T (T is never tiled)

    # Squeeze: global average pool over time, f32 accumulation.
    y = jnp.sum(x_ref[...], axis=2, dtype=jnp.float32) * inv_t          # (bb, C)

    # Excitation: 1x1 conv == channel matmul on the MXU, f32 accumulation.
    gate = jnp.dot(y, wt_ref[...],
                   preferred_element_type=jnp.float32) + b_ref[...]     # (bb, C)
    s = jax.nn.sigmoid(gate).astype(o_ref.dtype)                        # EUP

    # Scale: re-read x so the tile is not pinned in vregs across the gate math.
    o_ref[...] = x_ref[...] * s[:, :, None]


# -------------------------------- Wrapper ----------------------------------

def se_layer(x, conv_weight, conv_bias, *, block_b=None,
             vmem_block_budget_bytes=16 * 1024 * 1024):
    """Fused SE layer.

    x           : (B, C, T), float32 or bfloat16; output matches x.dtype
    conv_weight : (C, C, 1)  Conv1d(kernel_size=1) weight
    conv_bias   : (C,)       Conv1d bias
    """
    B, C, T = x.shape
    itemsize = jnp.dtype(x.dtype).itemsize

    if block_b is None:
        # Per grid step: in block + out block, each double-buffered by the
        # Pallas pipeline -> 4 * bb * C * T * itemsize bytes of VMEM.
        per_row = 4 * C * T * itemsize
        cap = max(1, vmem_block_budget_bytes // per_row)
        # >= 8 batch rows keeps the gating matmul M-dim / sublane tile filled;
        # as large as the budget allows to amortize the ~0.35us/step overhead.
        block_b = int(min(cap, max(8, min(B, 128))))
    block_b = max(1, int(block_b))

    # Pad batch to a multiple of the block. Padded rows are zero: their gate
    # is sigmoid(bias) * 0 = 0 and they are sliced off below.
    b_pad = pl.cdiv(B, block_b) * block_b
    x_p = jnp.pad(x, ((0, b_pad - B), (0, 0), (0, 0))) if b_pad != B else x

    w_t = jnp.transpose(conv_weight[:, :, 0]).astype(jnp.float32)  # (C_in, C_out)
    b2 = conv_bias.reshape(1, C).astype(jnp.float32)

    out = pl.pallas_call(
        se_layer_kernel,
        out_shape=jax.ShapeDtypeStruct((b_pad, C, T), x.dtype),
        grid=(b_pad // block_b,),
        in_specs=[
            pl.BlockSpec((block_b, C, T), lambda i: (i, 0, 0)),
            pl.BlockSpec((C, C), lambda i: (0, 0)),   # weights stay resident
            pl.BlockSpec((1, C), lambda i: (0, 0)),
        ],
        out_specs=pl.BlockSpec((block_b, C, T), lambda i: (i, 0, 0)),
        compiler_params=pltpu.CompilerParams(
            dimension_semantics=("parallel",)),       # 2-TC sharding on v7x
    )(x_p, w_t, b2)
    return out[:B] if b_pad != B else out


# --------------------------- Pure-JAX reference ----------------------------

def _ref_se_layer(x, conv_weight, conv_bias):
    y = jnp.mean(x, axis=2)                            # (B, C)
    y = y @ conv_weight[:, :, 0].T + conv_bias         # Conv1d(k=1) on (B, C, 1)
    s = jax.nn.sigmoid(y)
    return x * s[:, :, None]


# --------------------------------- Main ------------------------------------

if __name__ == "__main__":
    key = jax.random.PRNGKey(0)
    k_x, k_w, k_b, k_x2 = jax.random.split(key, 4)

    C, T = 64, 128

    # Conv1d(C, C, kernel_size=1): weight ~ Normal(0, 0.02) (module __init__),
    # bias ~ Uniform(-1/sqrt(C), 1/sqrt(C)) (PyTorch default).
    conv_weight = (0.02 * jax.random.normal(k_w, (C, C, 1))).astype(jnp.float32)
    bound = 1.0 / np.sqrt(C)
    conv_bias = jax.random.uniform(k_b, (C,), jnp.float32, -bound, bound)

    # Case 1: float32, B=2 (pads up to a single (8, C, T) block).
    x32 = jax.random.normal(k_x, (2, C, T), jnp.float32)
    out32 = jax.block_until_ready(se_layer(x32, conv_weight, conv_bias))
    ref32 = _ref_se_layer(x32, conv_weight, conv_bias)
    np.testing.assert_allclose(np.asarray(out32), np.asarray(ref32),
                               atol=1e-5, rtol=1e-5)
    assert out32.shape == x32.shape and out32.dtype == x32.dtype

    # Case 2: bfloat16 I/O (half the HBM traffic), B=32 with block_b=8 ->
    # a 4-step pipelined grid ("parallel" batch axis shards it on v7x).
    xbf = jax.random.normal(k_x2, (32, C, T), jnp.float32).astype(jnp.bfloat16)
    outbf = jax.block_until_ready(
        se_layer(xbf, conv_weight, conv_bias, block_b=8))
    refbf = _ref_se_layer(xbf.astype(jnp.float32), conv_weight, conv_bias)
    np.testing.assert_allclose(np.asarray(outbf.astype(jnp.float32)),
                               np.asarray(refbf), atol=5e-2, rtol=5e-2)
    assert outbf.dtype == jnp.bfloat16 and outbf.shape == xbf.shape

    print("KERNEL_OK")
</pallas_src>

<mosaic_0001>
module attributes {stable_mosaic.version = 11 : i64} {
  func.func @se_layer_kernel(%arg0: i32, %arg1: memref<8x64x128xf32, #tpu.memory_space<vmem>>, %arg2: memref<64x64xf32, #tpu.memory_space<vmem>>, %arg3: memref<1x64xf32, #tpu.memory_space<vmem>>, %arg4: memref<8x64x128xf32, #tpu.memory_space<vmem>>) attributes {dimension_semantics = [#tpu.dimension_semantics<parallel>], iteration_bounds = array<i64: 1>, scalar_prefetch = 0 : i64, scratch_operands = 0 : i64, tpu.core_type = #tpu.core_type<tc>, window_params = [{transform_indices = @transform_0, window_bounds = array<i64: 8, 64, 128>}, {pipeline_mode = #tpu.pipeline_mode<synchronous>, transform_indices = @transform_1, window_bounds = array<i64: 64, 64>}, {pipeline_mode = #tpu.pipeline_mode<synchronous>, transform_indices = @transform_2, window_bounds = array<i64: 1, 64>}, {transform_indices = @transform_3, window_bounds = array<i64: 8, 64, 128>}]} {
    %c0 = arith.constant 0 : index
    %c0_0 = arith.constant 0 : index
    %c0_1 = arith.constant 0 : index
    %0 = vector.load %arg1[%c0, %c0_0, %c0_1] : memref<8x64x128xf32, #tpu.memory_space<vmem>>, vector<8x64x128xf32>
    %cst = arith.constant dense<0.000000e+00> : vector<8x64xf32>
    %1 = vector.multi_reduction <add>, %0, %cst [2] : vector<8x64x128xf32> to vector<8x64xf32>
    %cst_2 = arith.constant 7.812500e-03 : f32
    %2 = vector.broadcast %cst_2 : f32 to vector<8x64xf32>
    %3 = arith.mulf %1, %2 : vector<8x64xf32>
    %c0_3 = arith.constant 0 : index
    %c0_4 = arith.constant 0 : index
    %4 = vector.load %arg2[%c0_3, %c0_4] : memref<64x64xf32, #tpu.memory_space<vmem>>, vector<64x64xf32>
    %cst_5 = arith.constant dense<0.000000e+00> : vector<8x64xf32>
    %5 = tpu.matmul %3, %4, %cst_5 {dimension_numbers = #tpu.dot_dimension_numbers<[1], [0], [0], [1], [0, 0, 1, 1], [], []>} : vector<8x64xf32>, vector<64x64xf32>, vector<8x64xf32> -> vector<8x64xf32>
    %c0_6 = arith.constant 0 : index
    %c0_7 = arith.constant 0 : index
    %6 = vector.load %arg3[%c0_6, %c0_7] : memref<1x64xf32, #tpu.memory_space<vmem>>, vector<1x64xf32>
    %7 = vector.broadcast %6 : vector<1x64xf32> to vector<8x64xf32>
    %8 = arith.addf %5, %7 : vector<8x64xf32>
    %9 = arith.negf %8 : vector<8x64xf32>
    %10 = math.exp %9 : vector<8x64xf32>
    %cst_8 = arith.constant 1.000000e+00 : f32
    %11 = vector.broadcast %cst_8 : f32 to vector<8x64xf32>
    %12 = arith.addf %11, %10 : vector<8x64xf32>
    %13 = arith.divf %11, %12 : vector<8x64xf32>
    %c0_9 = arith.constant 0 : index
    %c0_10 = arith.constant 0 : index
    %c0_11 = arith.constant 0 : index
    %14 = vector.load %arg1[%c0_9, %c0_10, %c0_11] : memref<8x64x128xf32, #tpu.memory_space<vmem>>, vector<8x64x128xf32>
    %15 = vector.shape_cast %13 : vector<8x64xf32> to vector<8x64x1xf32>
    %16 = vector.broadcast %15 : vector<8x64x1xf32> to vector<8x64x128xf32>
    %17 = arith.mulf %14, %16 : vector<8x64x128xf32>
    %c0_12 = arith.constant 0 : index
    %c0_13 = arith.constant 0 : index
    %c0_14 = arith.constant 0 : index
    %18 = vector.load %arg4[%c0_12, %c0_13, %c0_14] : memref<8x64x128xf32, #tpu.memory_space<vmem>>, vector<8x64x128xf32>
    tpu.vector_store %arg4[%c0_12, %c0_13, %c0_14], %17 {strides = array<i32>} : memref<8x64x128xf32, #tpu.memory_space<vmem>>, vector<8x64x128xf32>,
    return
  }
  func.func @transform_0(%arg0: i32) -> (i32, i32, i32) {
    %c0_i32 = arith.constant 0 : i32
    %c0_i32_0 = arith.constant 0 : i32
    %c0_i32_1 = arith.constant 0 : i32
    return %arg0, %c0_i32, %c0_i32_0 : i32, i32, i32
  }
  func.func @transform_1(%arg0: i32) -> (i32, i32) {
    %c0_i32 = arith.constant 0 : i32
    %c0_i32_0 = arith.constant 0 : i32
    %c0_i32_1 = arith.constant 0 : i32
    return %c0_i32, %c0_i32_0 : i32, i32
  }
  func.func @transform_2(%arg0: i32) -> (i32, i32) {
    %c0_i32 = arith.constant 0 : i32
    %c0_i32_0 = arith.constant 0 : i32
    %c0_i32_1 = arith.constant 0 : i32
    return %c0_i32, %c0_i32_0 : i32, i32
  }
  func.func @transform_3(%arg0: i32) -> (i32, i32, i32) {
    %c0_i32 = arith.constant 0 : i32
    %c0_i32_0 = arith.constant 0 : i32
    %c0_i32_1 = arith.constant 0 : i32
    return %arg0, %c0_i32, %c0_i32_0 : i32, i32, i32
  }
}

</mosaic_0001>

<bundles_post_ra>
// kernel: tpu_custom_call.1
= control target key start
LH: loop header
LB: loop body
LE: loop exit
PB: predicated region body
PF: predicated region fallthrough
CT: control target
= control target key end

     0   :  { %8 = vsyncpa [#allocation3], 0  ;;  %s1750_s0 = inlined_call_operand.hbm [shape: f32[8,64,128], index: 0, kind: input, shape index: {}]   ;;  %s1751_s1 = inlined_call_operand.hbm [shape: f32[64,64], index: 1, kind: input, shape index: {}]   ;;  %s1752_s2 = inlined_call_operand.vmem [shape: f32[1,64], index: 2, kind: input, shape index: {}]   ;;  %s1753_s3 = inlined_call_operand.hbm [shape: f32[8,64,128], index: 3, kind: output, shape index: {}]  }
   0x1   :  { %9 = vsyncpa [#allocation6], 0 }
   0x2   :  { %10 = vsyncpa [#allocation4], 0  ;;  %s1395_s12 = smov [#allocation2]  }
   0x3   :  { %s16_s13 = sshll.u32 %s1395_s12, 4  ;;  %s17_s13 = int_to_ptr.vmem [resolvable:$true] %s16_s13 }
   0x4   :  { %s1337_s14 = scalar_lea.vmem %s17_s13, 8192  ;;  %p1342_p1 = scmp.lt.s32.totalorder %s17_s13, %s17_s13 }
   0x5   :  { %p1338_p0 = scmp.ne.s32.totalorder %s17_s13, %s1337_s14  ;;  %p1343_p2 = scmp.lt.s32.totalorder %s1337_s14, %s1337_s14 }
   0x7   :  { %p1344_p3 = por %p1343_p2, %p1342_p1 }
   0x9   :  { %p1345_p4 = pnand %p1344_p3, %p1338_p0 }
   0xb   :  { %1348 = shalt.err (!%p1345_p4)
}
   0xc   :  { %s1396_s15 = smov 128   ;;  %s1397_s16 = smov 8  }
   0xd   :  { %22 = dma.hbm_to_vmem [thread:$0]  %s1750_s0, 8192, %s17_s13, [#allocation3], %s1396_s15, %s1396_s15, %s1397_s16  }
   0xe   :  { %s1398_s19 = smov [#allocation5]  }
   0xf   :  { %s28_s20 = sshll.u32 %s1398_s19, 4  ;;  %s29_s20 = int_to_ptr.vmem [resolvable:$true] %s28_s20 }
  0x10   :  { %s1357_s21 = scalar_lea.vmem %s29_s20, 1024  ;;  %p1362_p6 = scmp.lt.s32.totalorder %s29_s20, %s29_s20 }
  0x11   :  { %p1358_p5 = scmp.ne.s32.totalorder %s29_s20, %s1357_s21  ;;  %p1363_p7 = scmp.lt.s32.totalorder %s1357_s21, %s1357_s21 }
  0x13   :  { %p1364_p8 = por %p1363_p7, %p1362_p6 }
  0x15   :  { %p1365_p9 = pnand %p1364_p8, %p1358_p5 }
  0x17   :  { %1368 = shalt.err (!%p1365_p9)
}
  0x18   :  { %34 = dma.hbm_to_vmem [thread:$0]  %s1751_s1, 1024, %s29_s20, [#allocation6], %s1396_s15, %s1396_s15, %s1397_s16  }
  0x19   :  { %1389 = dma.done.wait [#allocation3], 8192  }
  0x1a   :  { %1390 = vsyncadd [#allocation3], 4294959104 }
  0x1b   :  { %1391 = dma.done.wait [#allocation6], 1024  }
  0x1c   :  { %1392 = vsyncadd [#allocation6], 4294966272  ;;  %v51_v0 = vld [vmem:[#allocation2 + $0x40] sm:$0xff]  ;;  %v52_v2 = vld [vmem:[#allocation2 + $0x48] sm:$0xff]  ;;  %vm1400_vm0 = vmmov 0   ;;  %vm389_vm1 = vcmask 130112  }
  0x1d   :  { %v43_v1 = vld [vmem:[#allocation2] sm:$0xff]  ;;  %123 = vadd.xlane.f32.xlu1 %v51_v0  ;;  %v44_v3 = vld [vmem:[#allocation2 + $0x8] sm:$0xff]  ;;  %v53_v4 = vld [vmem:[#allocation2 + $0x50] sm:$0xff]  ;;  %v1399_v0 = vmov 0.0   ;;  %vm396_vm2 = vcmask 195712   ;;  %vm403_vm3 = vcmask 261312  }
  0x1e   :  { %107 = vadd.xlane.f32.xlu0 %v43_v1  ;;  %v45_v5 = vld [vmem:[#allocation2 + $0x10] sm:$0xff]  ;;  %v60_v6 = vld [vmem:[#allocation2 + $0x88] sm:$0xff]  ;;  %v59_v7 = vld [vmem:[#allocation2 + $0x80] sm:$0xff]  ;;  %1237 = vmatprep.subr.mxu0 %v1399_v0  ;;  %vm410_vm4 = vcmask 326912   ;;  %vm417_vm5 = vcmask 392512   ;;  %vm424_vm6 = vcmask 458112  }
  0x1f   :  { %v54_v8 = vld [vmem:[#allocation2 + $0x58] sm:$0xff]  ;;  %v67_v10 = vld [vmem:[#allocation2 + $0xc0] sm:$0xff]  ;;  %v61_v11 = vld [vmem:[#allocation2 + $0x90] sm:$0xff]  ;;  %1253 = vmatprep.mubr.msk.f32.mxu0 %vm1400_vm0, %v1399_v0  ;;  %vm431_vm7 = vcmask 523712   ;;  %vm706_vm8 = vcmask 1041409   ;;  %vm708_vm9 = vcmask 1042434  }
  0x20   :  { %v46_v9 = vld [vmem:[#allocation2 + $0x18] sm:$0xff]  ;;  %v47_v12 = vld [vmem:[#allocation2 + $0x20] sm:$0xff]  ;;  %v68_v13 = vld [vmem:[#allocation2 + $0xc8] sm:$0xff]  ;;  %vm710_vm10 = vcmask 1043459   ;;  %vm712_vm11 = vcmask 1044484   ;;  %vm714_vm12 = vcmask 1045509  }
  0x21   :  { %125 = vadd.xlane.f32.xlu1 %v52_v2  ;;  %v62_v14 = vld [vmem:[#allocation2 + $0x98] sm:$0xff]  ;;  %v55_v15 = vld [vmem:[#allocation2 + $0x60] sm:$0xff]  ;;  %v69_v17 = vld [vmem:[#allocation2 + $0xd0] sm:$0xff]  ;;  %vm716_vm13 = vcmask 1046534   ;;  %vm718_vm14 = vcmask 1047559   ;;  %vm720_vm15 = vcmask 523264  }
  0x22   :  { %109 = vadd.xlane.f32.xlu0 %v44_v3  ;;  %v75_v16 = vld [vmem:[#allocation2 + $0x100] sm:$0xff]  ;;  %v48_v18 = vld [vmem:[#allocation2 + $0x28] sm:$0xff]  ;;  %v77_v22 = vld [vmem:[#allocation2 + $0x110] sm:$0xff] }
  0x23   :  { %v76_v19 = vld [vmem:[#allocation2 + $0x108] sm:$0xff]  ;;  %v63_v20 = vld [vmem:[#allocation2 + $0xa0] sm:$0xff]  ;;  %v70_v23 = vld [vmem:[#allocation2 + $0xd8] sm:$0xff] }
  0x24   :  { %v56_v21 = vld [vmem:[#allocation2 + $0x68] sm:$0xff]  ;;  %v83_v25 = vld [vmem:[#allocation2 + $0x140] sm:$0xff]  ;;  %v57_v26 = vld [vmem:[#allocation2 + $0x70] sm:$0xff] }
  0x25   :  { %127 = vadd.xlane.f32.xlu1 %v53_v4  ;;  %v84_v24 = vld [vmem:[#allocation2 + $0x148] sm:$0xff]  ;;  %v1434_v27 = vld [vmem:[#allocation2 + $0x30] sm:$0xff]  ;;  %v71_v28 = vld [vmem:[#allocation2 + $0xe0] sm:$0xff] }
  0x26   :  { %111 = vadd.xlane.f32.xlu0 %v45_v5  ;;  %v64_v29 = vld [vmem:[#allocation2 + $0xa8] sm:$0xff]  ;;  %v85_v30 = vld [vmem:[#allocation2 + $0x150] sm:$0xff]  ;;  %v78_v31 = vld [vmem:[#allocation2 + $0x118] sm:$0xff] }
  0x27   :  { %v92_v32 = vld [vmem:[#allocation2 + $0x188] sm:$0xff]  ;;  %v91_v33 = vld [vmem:[#allocation2 + $0x180] sm:$0xff]  ;;  %v58_v34 = vld [vmem:[#allocation2 + $0x78] sm:$0xff] }
  0x28   :  { %v1437_v35 = vld [vmem:[#allocation2 + $0x38] sm:$0xff]  ;;  %v72_v36 = vld [vmem:[#allocation2 + $0xe8] sm:$0xff]  ;;  %v65_v37 = vld [vmem:[#allocation2 + $0xb0] sm:$0xff] }
  0x29   :  { %141 = vadd.xlane.f32.xlu1 %v60_v6  ;;  %1755 = vst [vmem:[#allocation11_spill] sm:$0xff] %v1437_v35  ;;  %v86_v38 = vld [vmem:[#allocation2 + $0x158] sm:$0xff]  ;;  %v79_v39 = vld [vmem:[#allocation2 + $0x120] sm:$0xff]  ;;  %v93_v41 = vld [vmem:[#allocation2 + $0x190] sm:$0xff] }
  0x2a   :  { %139 = vadd.xlane.f32.xlu0 %v59_v7  ;;  %v99_v40 = vld [vmem:[#allocation2 + $0x1c0] sm:$0xff]  ;;  %v66_v42 = vld [vmem:[#allocation2 + $0xb8] sm:$0xff]  ;;  %v100_v43 = vld [vmem:[#allocation2 + $0x1c8] sm:$0xff] }
  0x2b   :  { %v80_v44 = vld [vmem:[#allocation2 + $0x128] sm:$0xff]  ;;  %v73_v45 = vld [vmem:[#allocation2 + $0xf0] sm:$0xff]  ;;  %v94_v46 = vld [vmem:[#allocation2 + $0x198] sm:$0xff] }
  0x2c   :  { %v87_v47 = vld [vmem:[#allocation2 + $0x160] sm:$0xff]  ;;  %v74_v48 = vld [vmem:[#allocation2 + $0xf8] sm:$0xff]  ;;  %v101_v49 = vld [vmem:[#allocation2 + $0x1d0] sm:$0xff] }
  0x2d   :  { %129 = vadd.xlane.f32.xlu1 %v54_v8  ;;  %v88_v50 = vld [vmem:[#allocation2 + $0x168] sm:$0xff]  ;;  %v81_v51 = vld [vmem:[#allocation2 + $0x130] sm:$0xff]  ;;  %v102_v52 = vld [vmem:[#allocation2 + $0x1d8] sm:$0xff] }
  0x2e   :  { %113 = vadd.xlane.f32.xlu0 %v46_v9  ;;  %v95_v53 = vld [vmem:[#allocation2 + $0x1a0] sm:$0xff]  ;;  %v89_v54 = vld [vmem:[#allocation2 + $0x170] sm:$0xff]  ;;  %v82_v55 = vld [vmem:[#allocation2 + $0x138] sm:$0xff] }
  0x2f   :  { %v103_v56 = vld [vmem:[#allocation2 + $0x1e0] sm:$0xff]  ;;  %v96_v57 = vld [vmem:[#allocation2 + $0x1a8] sm:$0xff]  ;;  %v97_v58 = vld [vmem:[#allocation2 + $0x1b0] sm:$0xff] }
  0x30   :  { %v90_v59 = vld [vmem:[#allocation2 + $0x178] sm:$0xff]  ;;  %v104_v61 = vld [vmem:[#allocation2 + $0x1e8] sm:$0xff]  ;;  %v105_v62 = vld [vmem:[#allocation2 + $0x1f0] sm:$0xff] }
  0x31   :  { %155 = vadd.xlane.f32.xlu1 %v67_v10  ;;  %v98_v60 = vld [vmem:[#allocation2 + $0x1b8] sm:$0xff]  ;;  %v305_v2 = vld [vmem:[#allocation5 + $0x30] sm:$0xff]  ;;  %v304_v3 = vld [vmem:[#allocation5 + $0x28] sm:$0xff] }
  0x32   :  { %143 = vadd.xlane.f32.xlu0 %v61_v11  ;;  %v106_v63 = vld [vmem:[#allocation2 + $0x1f8] sm:$0xff]  ;;  %v303_v4 = vld [vmem:[#allocation5 + $0x20] sm:$0xff]  ;;  %v301_v6 = vld [vmem:[#allocation5 + $0x10] sm:$0xff] }
  0x33   :  { %v306_v1 = vld [vmem:[#allocation5 + $0x38] sm:$0xff]  ;;  %v300_v9 = vld [vmem:[#allocation5 + $0x8] sm:$0xff]  ;;  %v299_v10 = vld [vmem:[#allocation5] sm:$0xff] }
  0x34   :  { %1238 = vmatpush3.msra.mxu0 %v306_v1  ;;  %v302_v5 = vld [vmem:[#allocation5 + $0x18] sm:$0xff] }
  0x35   :  { %115 = vadd.xlane.f32.xlu1 %v47_v12  ;;  %1239 = vmatprep.subr.mxu0 %v1399_v0 }
  0x36   :  { %157 = vadd.xlane.f32.xlu0 %v68_v13  ;;  %1240 = vmatpush3.msra.mxu0 %v305_v2 }
  0x37   :  { %1241 = vmatprep.subr.mxu0 %v1399_v0 }
  0x38   :  { %1242 = vmatpush3.msra.mxu0 %v304_v3 }
  0x39   :  { %145 = vadd.xlane.f32.xlu1 %v62_v14  ;;  %1243 = vmatprep.subr.mxu0 %v1399_v0 }
  0x3a   :  { %131 = vadd.xlane.f32.xlu0 %v55_v15  ;;  %1244 = vmatpush3.msra.mxu0 %v303_v4 }
  0x3b   :  { %1245 = vmatprep.subr.mxu0 %v1399_v0 }
  0x3c   :  { %1246 = vmatpush3.msra.mxu0 %v302_v5 }
  0x3d   :  { %171 = vadd.xlane.f32.xlu1 %v75_v16  ;;  %1247 = vmatprep.subr.mxu0 %v1399_v0 }
  0x3e   :  { %159 = vadd.xlane.f32.xlu0 %v69_v17  ;;  %1248 = vmatpush3.msra.mxu0 %v301_v6 }
  0x3f   :  { %1249 = vmatprep.subr.mxu0 %v1399_v0 }
  0x40   :  { %1250 = vmatpush3.msra.mxu0 %v300_v9 }
  0x41   :  { %117 = vadd.xlane.f32.xlu1 %v48_v18  ;;  %1251 = vmatprep.subr.mxu0 %v1399_v0 }
  0x42   :  { %173 = vadd.xlane.f32.xlu0 %v76_v19  ;;  %1252 = vmatpush3.msra.mxu0 %v299_v10 }
  0x45   :  { %147 = vadd.xlane.f32.xlu1 %v63_v20 }
  0x46   :  { %133 = vadd.xlane.f32.xlu0 %v56_v21 }
  0x49   :  { %175 = vadd.xlane.f32.xlu1 %v77_v22 }
  0x4a   :  { %161 = vadd.xlane.f32.xlu0 %v70_v23 }
  0x4d   :  { %189 = vadd.xlane.f32.xlu1 %v84_v24 }
  0x4e   :  { %187 = vadd.xlane.f32.xlu0 %v83_v25 }
  0x51   :  { %135 = vadd.xlane.f32.xlu1 %v57_v26 }
  0x52   :  { %119 = vadd.xlane.f32.xlu0 %v1434_v27 }
  0x55   :  { %163 = vadd.xlane.f32.xlu1 %v71_v28 }
  0x56   :  { %149 = vadd.xlane.f32.xlu0 %v64_v29 }
  0x59   :  { %191 = vadd.xlane.f32.xlu1 %v85_v30 }
  0x5a   :  { %177 = vadd.xlane.f32.xlu0 %v78_v31 }
  0x5d   :  { %205 = vadd.xlane.f32.xlu1 %v92_v32 }
  0x5e   :  { %203 = vadd.xlane.f32.xlu0 %v91_v33 }
  0x61   :  { %137 = vadd.xlane.f32.xlu1 %v58_v34 }
  0x62   :  { %121 = vadd.xlane.f32.xlu0 %v1437_v35 }
  0x65   :  { %165 = vadd.xlane.f32.xlu1 %v72_v36 }
  0x66   :  { %151 = vadd.xlane.f32.xlu0 %v65_v37 }
  0x69   :  { %193 = vadd.xlane.f32.xlu1 %v86_v38 }
  0x6a   :  { %179 = vadd.xlane.f32.xlu0 %v79_v39 }
  0x6d   :  { %219 = vadd.xlane.f32.xlu1 %v99_v40 }
  0x6e   :  { %207 = vadd.xlane.f32.xlu0 %v93_v41 }
  0x71   :  { %153 = vadd.xlane.f32.xlu1 %v66_v42 }
  0x72   :  { %221 = vadd.xlane.f32.xlu0 %v100_v43 }
  0x75   :  { %181 = vadd.xlane.f32.xlu1 %v80_v44 }
  0x76   :  { %167 = vadd.xlane.f32.xlu0 %v73_v45  ;;  %v378_v45 = vlaneseq }
  0x79   :  { %209 = vadd.xlane.f32.xlu1 %v94_v46 }
  0x7a   :  { %195 = vadd.xlane.f32.xlu0 %v87_v47 }
  0x7d   :  { %169 = vadd.xlane.f32.xlu1 %v74_v48  ;;  %v379_v48 = vand.u32 127, %v378_v45 }
  0x7e   :  { %223 = vadd.xlane.f32.xlu0 %v101_v49 }
  0x81   :  { %197 = vadd.xlane.f32.xlu1 %v88_v50 }
  0x82   :  { %183 = vadd.xlane.f32.xlu0 %v81_v51  ;;  %v1496_v51 = vshrl.u32 %v378_v45, 7  ;;  %v412_v45 = vadd.s32 4294967256, %v379_v48 }
  0x85   :  { %225 = vadd.xlane.f32.xlu1 %v102_v52  ;;  %v384_v52 = vadd.s32 4294967288, %v379_v48 }
  0x86   :  { %211 = vadd.xlane.f32.xlu0 %v95_v53  ;;  %v391_v53 = vadd.s32 4294967280, %v379_v48 }
  0x89   :  { %199 = vadd.xlane.f32.xlu1 %v89_v54  ;;  %v398_v54 = vadd.s32 4294967272, %v379_v48 }
  0x8a   :  { %185 = vadd.xlane.f32.xlu0 %v82_v55 }
  0x8b   :  { %v1512_v2 = vsub.s32 %v398_v54, %v1496_v51 }
  0x8d   :  { %227 = vadd.xlane.f32.xlu1 %v103_v56 }
  0x8e   :  { %213 = vadd.xlane.f32.xlu0 %v96_v57  ;;  %v405_v57 = vadd.s32 4294967264, %v379_v48 }
  0x91   :  { %215 = vadd.xlane.f32.xlu1 %v97_v58  ;;  %v1503_v58 = vsub.s32 %v379_v48, %v1496_v51 }
  0x92   :  { %201 = vadd.xlane.f32.xlu0 %v90_v59  ;;  %v1506_v59 = vsub.s32 %v384_v52, %v1496_v51  ;;  %v426_v52 = vadd.s32 4294967240, %v379_v48 }
  0x95   :  { %217 = vadd.xlane.f32.xlu1 %v98_v60 }
  0x96   :  { %229 = vadd.xlane.f32.xlu0 %v104_v61 }
  0x99   :  { %233 = vadd.xlane.f32.xlu1 %v106_v63 }
  0x9a   :  { %231 = vadd.xlane.f32.xlu0 %v105_v62  ;;  %v1509_v62 = vsub.s32 %v391_v53, %v1496_v51 }
  0xa6   :  { %v124_v7 = vpop.xlane.xlu1 %123 }
  0xa7   :  { %v108_v8 = vpop.xlane.xlu0 %107  ;;  %v243_v60 = vmul.f32 0.0078125, %v124_v7  ;;  %v1519_v7 = vsub.s32 %v405_v57, %v1496_v51 }
  0xa8   :  { %v235_v61 = vmul.f32 0.0078125, %v108_v8 }
  0xaa   :  { %v126_v11 = vpop.xlane.xlu1 %125 }
  0xab   :  { %v110_v12 = vpop.xlane.xlu0 %109  ;;  %v244_v63 = vmul.f32 0.0078125, %v126_v11  ;;  %v436_v11 = vrot.slane %v243_v60, %v1503_v58 }
  0xac   :  { %v236_v0 = vmul.f32 0.0078125, %v110_v12  ;;  %v383_v12 = vrot.slane %v235_v61, %v1503_v58 }
  0xad   :  { %v440_v53 = vrot.slane %v244_v63, %v1506_v59 }
  0xae   :  { %v128_v13 = vpop.xlane.xlu1 %127  ;;  %v388_v54 = vrot.slane %v236_v0, %v1506_v59 }
  0xaf   :  { %v112_v14 = vpop.xlane.xlu0 %111  ;;  %v245_v1 = vmul.f32 0.0078125, %v128_v13  ;;  %v419_v13 = vadd.s32 4294967248, %v379_v48 }
  0xb0   :  { %v237_v5 = vmul.f32 0.0078125, %v112_v14 }
  0xb1   :  { %v445_v14 = vrot.slane %v245_v1, %v1509_v62  ;;  %v1540_v1 = vsub.s32 %v412_v45, %v1496_v51 }
  0xb2   :  { %v142_v15 = vpop.xlane.xlu1 %141 }
  0xb3   :  { %v140_v16 = vpop.xlane.xlu0 %139  ;;  %v252_v6 = vmul.f32 0.0078125, %v142_v15 }
  0xb4   :  { %v251_v8 = vmul.f32 0.0078125, %v140_v16 }
  0xb6   :  { %v130_v17 = vpop.xlane.xlu1 %129  ;;  %v475_v61 = vrot.slane %v251_v8, %v1503_v58 }
  0xb7   :  { %v114_v18 = vpop.xlane.xlu0 %113  ;;  %v246_v9 = vmul.f32 0.0078125, %v130_v17  ;;  %v395_v17 = vrot.slane %v237_v5, %v1509_v62  ;;  %v1543_v5 = vsub.s32 %v419_v13, %v1496_v51 }
  0xb8   :  { %v238_v10 = vmul.f32 0.0078125, %v114_v18  ;;  %v479_v18 = vrot.slane %v252_v6, %v1506_v59  ;;  %v1546_v6 = vsub.s32 %v426_v52, %v1496_v51 }
  0xb9   :  { %v450_v63 = vrot.slane %v246_v9, %v1512_v2 }
  0xba   :  { %v1440_v19 = vpop.xlane.xlu1 %155  ;;  %v402_v0 = vrot.slane %v238_v10, %v1512_v2 }
  0xbb   :  { %v1442_v20 = vpop.xlane.xlu0 %143 }
  0xbc   :  { %v253_v15 = vmul.f32 0.0078125, %v1442_v20  ;;  %v259_v20 = vmul.f32 0.0078125, %v1440_v19 }
  0xbe   :  { %v1444_v21 = vpop.xlane.xlu1 %115  ;;  %v484_v8 = vrot.slane %v253_v15, %v1509_v62 }
  0xbf   :  { %v1446_v22 = vpop.xlane.xlu0 %157  ;;  %v239_v60 = vmul.f32 0.0078125, %v1444_v21  ;;  %v441_v21 = vsel %vm389_vm1, %v440_v53, %v436_v11  ;;  %v480_v11 = vsel %vm389_vm1, %v479_v18, %v475_v61 }
  0xc0   :  { %v260_v48 = vmul.f32 0.0078125, %v1446_v22  ;;  %v390_v22 = vsel %vm389_vm1, %v388_v54, %v383_v12  ;;  %v446_v45 = vsel %vm396_vm2, %v445_v14, %v441_v21 }
  0xc1   :  { %v397_v13 = vsel %vm396_vm2, %v395_v17, %v390_v22  ;;  %v409_v52 = vrot.slane %v239_v60, %v1519_v7  ;;  %v451_v12 = vsel %vm403_vm3, %v450_v63, %v446_v45  ;;  %v485_v60 = vsel %vm396_vm2, %v484_v8, %v480_v11 }
  0xc2   :  { %v1448_v23 = vpop.xlane.xlu1 %145  ;;  %v518_v35 = vrot.slane %v260_v48, %v1506_v59  ;;  %v404_v53 = vsel %vm403_vm3, %v402_v0, %v397_v13 }
  0xc3   :  { %v1450_v24 = vpop.xlane.xlu0 %131  ;;  %v254_v9 = vmul.f32 0.0078125, %v1448_v23  ;;  %v514_v23 = vrot.slane %v259_v20, %v1503_v58 }
  0xc4   :  { %v247_v54 = vmul.f32 0.0078125, %v1450_v24  ;;  %v411_v24 = vsel %vm410_vm4, %v409_v52, %v404_v53 }
  0xc5   :  { %v489_v48 = vrot.slane %v254_v9, %v1512_v2 }
  0xc6   :  { %v1452_v25 = vpop.xlane.xlu1 %171  ;;  %v455_v22 = vrot.slane %v247_v54, %v1519_v7 }
  0xc7   :  { %v1454_v26 = vpop.xlane.xlu0 %159  ;;  %v267_v18 = vmul.f32 0.0078125, %v1452_v25 }
  0xc8   :  { %v261_v15 = vmul.f32 0.0078125, %v1454_v26  ;;  %v519_v26 = vsel %vm389_vm1, %v518_v35, %v514_v23 }
  0xca   :  { %v1456_v28 = vpop.xlane.xlu1 %117  ;;  %v523_v8 = vrot.slane %v261_v15, %v1509_v62  ;;  %v456_v15 = vsel %vm410_vm4, %v455_v22, %v451_v12 }
  0xcb   :  { %v1458_v29 = vpop.xlane.xlu0 %173  ;;  %v240_v14 = vmul.f32 0.0078125, %v1456_v28 }
  0xcc   :  { %v268_v17 = vmul.f32 0.0078125, %v1458_v29 }
  0xcd   :  { %v416_v9 = vrot.slane %v240_v14, %v1540_v1  ;;  %v524_v14 = vsel %vm396_vm2, %v523_v8, %v519_v26 }
  0xce   :  { %v1460_v30 = vpop.xlane.xlu1 %147  ;;  %v557_v35 = vrot.slane %v268_v17, %v1506_v59 }
  0xcf   :  { %v1462_v31 = vpop.xlane.xlu0 %133  ;;  %v255_v61 = vmul.f32 0.0078125, %v1460_v30  ;;  %v418_v17 = vsel %vm417_vm5, %v416_v9, %v411_v24 }
  0xd0   :  { %v248_v28 = vmul.f32 0.0078125, %v1462_v31  ;;  %v490_v31 = vsel %vm403_vm3, %v489_v48, %v485_v60 }
  0xd2   :  { %v1464_v32 = vpop.xlane.xlu1 %175 }
  0xd3   :  { %v1466_v33 = vpop.xlane.xlu0 %161  ;;  %v269_v29 = vmul.f32 0.0078125, %v1464_v32  ;;  %v553_v32 = vrot.slane %v267_v18, %v1503_v58 }
  0xd4   :  { %v262_v20 = vmul.f32 0.0078125, %v1466_v33  ;;  %v494_v33 = vrot.slane %v255_v61, %v1519_v7 }
  0xd5   :  { %v562_v13 = vrot.slane %v269_v29, %v1509_v62  ;;  %v558_v60 = vsel %vm389_vm1, %v557_v35, %v553_v32 }
  0xd6   :  { %v1468_v34 = vpop.xlane.xlu1 %189  ;;  %v528_v53 = vrot.slane %v262_v20, %v1512_v2 }
  0xd7   :  { %v1470_v36 = vpop.xlane.xlu0 %187  ;;  %v276_v21 = vmul.f32 0.0078125, %v1468_v34  ;;  %v563_v26 = vsel %vm396_vm2, %v562_v13, %v558_v60 }
  0xd8   :  { %v275_v25 = vmul.f32 0.0078125, %v1470_v36  ;;  %v529_v20 = vsel %vm403_vm3, %v528_v53, %v524_v14 }
  0xd9   :  { %v596_v23 = vrot.slane %v276_v21, %v1506_v59 }
  0xda   :  { %v1472_v37 = vpop.xlane.xlu1 %135  ;;  %v592_v54 = vrot.slane %v275_v25, %v1503_v58 }
  0xdb   :  { %v1474_v38 = vpop.xlane.xlu0 %119  ;;  %v249_v30 = vmul.f32 0.0078125, %v1472_v37  ;;  %v460_v37 = vrot.slane %v248_v28, %v1540_v1 }
  0xdc   :  { %v241_v34 = vmul.f32 0.0078125, %v1474_v38  ;;  %v597_v21 = vsel %vm389_vm1, %v596_v23, %v592_v54 }
  0xdd   :  { %v465_v38 = vrot.slane %v249_v30, %v1543_v5  ;;  %v461_v12 = vsel %vm417_vm5, %v460_v37, %v456_v15 }
  0xde   :  { %v1476_v39 = vpop.xlane.xlu1 %163 }
  0xdf   :  { %v1478_v40 = vpop.xlane.xlu0 %149  ;;  %v263_v52 = vmul.f32 0.0078125, %v1476_v39  ;;  %v495_v39 = vsel %vm410_vm4, %v494_v33, %v490_v31 }
  0xe0   :  { %v256_v11 = vmul.f32 0.0078125, %v1478_v40  ;;  %v423_v40 = vrot.slane %v241_v34, %v1543_v5 }
  0xe1   :  { %v533_v24 = vrot.slane %v263_v52, %v1519_v7 }
  0xe2   :  { %v1480_v41 = vpop.xlane.xlu1 %191  ;;  %v499_v29 = vrot.slane %v256_v11, %v1540_v1  ;;  %v425_v9 = vsel %vm424_vm6, %v423_v40, %v418_v17 }
  0xe3   :  { %v1482_v42 = vpop.xlane.xlu0 %177 }
  0xe4   :  { %v270_v25 = vmul.f32 0.0078125, %v1482_v42  ;;  %v534_v42 = vsel %vm410_vm4, %v533_v24, %v529_v20 }
  0xe6   :  { %v1484_v43 = vpop.xlane.xlu1 %205 }
  0xe7   :  { %v1486_v44 = vpop.xlane.xlu0 %203  ;;  %v284_v30 = vmul.f32 0.0078125, %v1484_v43  ;;  %v500_v43 = vsel %vm417_vm5, %v499_v29, %v495_v39 }
  0xe8   :  { %v283_v22 = vmul.f32 0.0078125, %v1486_v44 }
  0xe9   :  { %v635_v11 = vrot.slane %v284_v30, %v1506_v59 }
  0xea   :  { %v1488_v46 = vpop.xlane.xlu1 %137  ;;  %v631_v53 = vrot.slane %v283_v22, %v1503_v58 }
  0xeb   :  { %v1490_v47 = vpop.xlane.xlu0 %121  ;;  %v250_v48 = vmul.f32 0.0078125, %v1488_v46  ;;  %v466_v46 = vsel %vm424_vm6, %v465_v38, %v461_v12 }
  0xec   :  { %v242_v18 = vmul.f32 0.0078125, %v1490_v47  ;;  %v277_v47 = vmul.f32 0.0078125, %v1480_v41 }
  0xed   :  { %v470_v35 = vrot.slane %v250_v48, %v1546_v6 }
  0xee   :  { %v1492_v49 = vpop.xlane.xlu1 %165  ;;  %v430_v31 = vrot.slane %v242_v18, %v1546_v6  ;;  %v601_v34 = vrot.slane %v277_v47, %v1509_v62  ;;  %v636_v18 = vsel %vm389_vm1, %v635_v11, %v631_v53 }
  0xef   :  { %v1494_v50 = vpop.xlane.xlu0 %151  ;;  %v264_v44 = vmul.f32 0.0078125, %v1492_v49  ;;  %v471_v49 = vsel %vm431_vm7, %v470_v35, %v466_v46 }
  0xf0   :  { %v257_v8 = vmul.f32 0.0078125, %v1494_v50  ;;  %v602_v60 = vsel %vm396_vm2, %v601_v34, %v597_v21 }
  0xf2   :  { %v1498_v55 = vpop.xlane.xlu1 %193  ;;  %v504_v23 = vrot.slane %v257_v8, %v1543_v5 }
  0xf3   :  { %v1500_v56 = vpop.xlane.xlu0 %179  ;;  %v278_v50 = vmul.f32 0.0078125, %v1498_v55  ;;  %v432_v55 = vsel %vm431_vm7, %v430_v31, %v425_v9 }
  0xf4   :  { %v271_v37 = vmul.f32 0.0078125, %v1500_v56  ;;  %v505_v12 = vsel %vm424_vm6, %v504_v23, %v500_v43 }
  0xf5   :  { %v606_v15 = vrot.slane %v278_v50, %v1512_v2 }
  0xf6   :  { %v1514_v3 = vpop.xlane.xlu1 %219  ;;  %v572_v39 = vrot.slane %v271_v37, %v1519_v7 }
  0xf7   :  { %v1516_v4 = vpop.xlane.xlu0 %207  ;;  %v291_v54 = vmul.f32 0.0078125, %v1514_v3 }
  0xf8   :  { %v285_v13 = vmul.f32 0.0078125, %v1516_v4 }
  0xfa   :  { %v1527_v57 = vpop.xlane.xlu1 %153  ;;  %v640_v40 = vrot.slane %v285_v13, %v1509_v62 }
  0xfb   :  { %v1529_v16 = vpop.xlane.xlu0 %221  ;;  %v258_v32 = vmul.f32 0.0078125, %v1527_v57  ;;  %v567_v57 = vrot.slane %v270_v25, %v1512_v2 }
  0xfc   :  { %v292_v52 = vmul.f32 0.0078125, %v1529_v16  ;;  %v538_v16 = vrot.slane %v264_v44, %v1540_v1  ;;  %v641_v30 = vsel %vm396_vm2, %v640_v40, %v636_v18 }
  0xfd   :  { %v509_v56 = vrot.slane %v258_v32, %v1546_v6  ;;  %v568_v48 = vsel %vm403_vm3, %v567_v57, %v563_v26  ;;  %v607_v26 = vsel %vm403_vm3, %v606_v15, %v602_v60 }
  0xfe   :  { %v1552_v19 = vpop.xlane.xlu1 %181  ;;  %v674_v3 = vrot.slane %v292_v52, %v1506_v59  ;;  %v539_v59 = vsel %vm417_vm5, %v538_v16, %v534_v42 }
  0xff   :  { %v1554_v10 = vpop.xlane.xlu0 %167  ;;  %v272_v14 = vmul.f32 0.0078125, %v1552_v19  ;;  %v707_v19 = vsel %vm706_vm8, %v471_v49, %v432_v55  ;;  %v510_v29 = vsel %vm431_vm7, %v509_v56, %v505_v12 }
 0x100   :  { %v265_v17 = vmul.f32 0.0078125, %v1554_v10  ;;  %v670_v10 = vrot.slane %v291_v54, %v1503_v58 }
 0x101   :  { %v577_v47 = vrot.slane %v272_v14, %v1540_v1 }
 0x102   :  { %v1572_v63 = vpop.xlane.xlu1 %209  ;;  %v543_v25 = vrot.slane %v265_v17, %v1543_v5  ;;  %v675_v58 = vsel %vm389_vm1, %v674_v3, %v670_v10 }
 0x103   :  { %v1574_v0 = vpop.xlane.xlu0 %195  ;;  %v286_v24 = vmul.f32 0.0078125, %v1572_v63  ;;  %v573_v63 = vsel %vm410_vm4, %v572_v39, %v568_v48 }
 0x104   :  { %v279_v20 = vmul.f32 0.0078125, %v1574_v0  ;;  %v709_v0 = vsel %vm708_vm9, %v510_v29, %v707_v19  ;;  %v578_v34 = vsel %vm417_vm5, %v577_v47, %v573_v63 }
 0x105   :  { %v645_v8 = vrot.slane %v286_v24, %v1512_v2 }
 0x106   :  { %v1592_v45 = vpop.xlane.xlu1 %169  ;;  %v611_v31 = vrot.slane %v279_v20, %v1519_v7 }
 0x107   :  { %v1594_v36 = vpop.xlane.xlu0 %223  ;;  %v266_v22 = vmul.f32 0.0078125, %v1592_v45  ;;  %v544_v45 = vsel %vm424_vm6, %v543_v25, %v539_v59 }
 0x108   :  { %v293_v9 = vmul.f32 0.0078125, %v1594_v36  ;;  %v612_v23 = vsel %vm410_vm4, %v611_v31, %v607_v26 }
 0x109   :  { %v548_v52 = vrot.slane %v266_v22, %v1546_v6 }
 0x10a   :  { %v1612_v61 = vpop.xlane.xlu1 %197 }
 0x10b   :  { %v1614_v28 = vpop.xlane.xlu0 %183  ;;  %v280_v35 = vmul.f32 0.0078125, %v1612_v61  ;;  %v549_v15 = vsel %vm431_vm7, %v548_v52, %v544_v45 }
 0x10c   :  { %v273_v32 = vmul.f32 0.0078125, %v1614_v28  ;;  %v646_v28 = vsel %vm403_vm3, %v645_v8, %v641_v30 }
 0x10d   :  { %v616_v11 = vrot.slane %v280_v35, %v1540_v1 }
 0x10e   :  { %v1632_v33 = vpop.xlane.xlu1 %225  ;;  %v582_v49 = vrot.slane %v273_v32, %v1543_v5 }
 0x10f   :  { %v212_v41 = vpop.xlane.xlu0 %211  ;;  %v294_v36 = vmul.f32 0.0078125, %v1632_v33  ;;  %v617_v40 = vsel %vm417_vm5, %v616_v11, %v612_v23 }
 0x110   :  { %v287_v42 = vmul.f32 0.0078125, %v212_v41  ;;  %v679_v41 = vrot.slane %v293_v9, %v1509_v62  ;;  %v583_v18 = vsel %vm424_vm6, %v582_v49, %v578_v34  ;;  %v801_v34 = vsub.s32 0, %v1496_v51 }
 0x111   :  { %v684_v14 = vrot.slane %v294_v36, %v1512_v2  ;;  %v871_v36 = vsub.s32 2, %v1496_v51  ;;  %v1011_v49 = vsub.s32 6, %v1496_v51 }
 0x112   :  { %v200_v38 = vpop.xlane.xlu1 %199  ;;  %v650_v55 = vrot.slane %v287_v42, %v1519_v7  ;;  %v680_v39 = vsel %vm396_vm2, %v679_v41, %v675_v58  ;;  %v941_v41 = vsub.s32 4, %v1496_v51 }
 0x113   :  { %v186_v4 = vpop.xlane.xlu0 %185  ;;  %v281_v43 = vmul.f32 0.0078125, %v200_v38  ;;  %v685_v59 = vsel %vm403_vm3, %v684_v14, %v680_v39  ;;  %v1270_v39 = vld [vmem:[#allocation2 + $0x20] sm:$0xff] }
 0x114   :  { %v274_v37 = vmul.f32 0.0078125, %v186_v4  ;;  %v651_v12 = vsel %vm410_vm4, %v650_v55, %v646_v28 }
 0x115   :  { %v621_v54 = vrot.slane %v281_v43, %v1543_v5 }
 0x116   :  { %v228_v21 = vpop.xlane.xlu1 %227  ;;  %v587_v38 = vrot.slane %v274_v37, %v1546_v6 }
 0x117   :  { %v214_v46 = vpop.xlane.xlu0 %213  ;;  %v295_v53 = vmul.f32 0.0078125, %v228_v21  ;;  %v622_v24 = vsel %vm424_vm6, %v621_v54, %v617_v40  ;;  %v1046_v54 = vsub.s32 7, %v1496_v51 }
 0x118   :  { %v288_v13 = vmul.f32 0.0078125, %v214_v46  ;;  %v588_v29 = vsel %vm431_vm7, %v587_v38, %v583_v18  ;;  %v1271_v18 = vld [vmem:[#allocation2 + $0x18] sm:$0xff] }
 0x119   :  { %v689_v3 = vrot.slane %v295_v53, %v1519_v7  ;;  %v711_v7 = vsel %vm710_vm10, %v549_v15, %v709_v0  ;;  %v976_v53 = vsub.s32 5, %v1496_v51 }
 0x11a   :  { %v216_v44 = vpop.xlane.xlu1 %215  ;;  %v655_v4 = vrot.slane %v288_v13, %v1540_v1  ;;  %v713_v58 = vsel %vm712_vm11, %v588_v29, %v711_v7  ;;  %v836_v13 = vsub.s32 1, %v1496_v51 }
 0x11b   :  { %v202_v50 = vpop.xlane.xlu0 %201  ;;  %v289_v61 = vmul.f32 0.0078125, %v216_v44  ;;  %v690_v25 = vsel %vm410_vm4, %v689_v3, %v685_v59  ;;  %v1756_v59 = vld [vmem:[#allocation11_spill] sm:$0xff] }
 0x11c   :  { %v282_v57 = vmul.f32 0.0078125, %v202_v50  ;;  %v656_v20 = vsel %vm417_vm5, %v655_v4, %v651_v12  ;;  %v1267_v4 = vld [vmem:[#allocation2 + $0x8] sm:$0xff] }
 0x11d   :  { %v660_v17 = vrot.slane %v289_v61, %v1543_v5 }
 0x11e   :  { %v218_v33 = vpop.xlane.xlu1 %217  ;;  %v626_v60 = vrot.slane %v282_v57, %v1546_v6  ;;  %v906_v57 = vsub.s32 3, %v1496_v51 }
 0x11f   :  { %v230_v56 = vpop.xlane.xlu0 %229  ;;  %v290_v16 = vmul.f32 0.0078125, %v218_v33  ;;  %v661_v26 = vsel %vm424_vm6, %v660_v17, %v656_v20  ;;  %v1269_v17 = vld [vmem:[#allocation2 + $0x10] sm:$0xff]  ;;  %v1273_v20 = vld [vmem:[#allocation2 + $0x40] sm:$0xff] }
 0x120   :  { %v296_v62 = vmul.f32 0.0078125, %v230_v56  ;;  %v627_v47 = vsel %vm431_vm7, %v626_v60, %v622_v24 }
 0x121   :  { %v665_v48 = vrot.slane %v290_v16, %v1546_v6  ;;  %v715_v8 = vsel %vm714_vm12, %v627_v47, %v713_v58  ;;  %v1274_v47 = vld [vmem:[#allocation2 + $0x50] sm:$0xff]  ;;  %v1276_v58 = vld [vmem:[#allocation2 + $0x60] sm:$0xff] }
 0x122   :  { %v694_v2 = vrot.slane %v296_v62, %v1540_v1  ;;  %v234_v10 = vpop.xlane.xlu1 %233  ;;  %v1268_v62 = vld [vmem:[#allocation2] sm:$0xff] }
 0x123   :  { %v232_v19 = vpop.xlane.xlu0 %231  ;;  %v298_v46 = vmul.f32 0.0078125, %v234_v10  ;;  %v666_v1 = vsel %vm431_vm7, %v665_v48, %v661_v26  ;;  %v1272_v10 = vld [vmem:[#allocation2 + $0x28] sm:$0xff] }
 0x124   :  { %v297_v21 = vmul.f32 0.0078125, %v232_v19  ;;  %v695_v22 = vsel %vm417_vm5, %v694_v2, %v690_v25  ;;  %v717_v35 = vsel %vm716_vm13, %v666_v1, %v715_v8 }
 0x125   :  { %v704_v30 = vrot.slane %v298_v46, %v1546_v6 }
 0x126   :  { %v699_v63 = vrot.slane %v297_v21, %v1543_v5  ;;  %v1225_v5 = vld [vmem:[%s1752_s2] ss:$0 sm:$0xff]  ;;  %s1401_s2 = smov [#allocation7]  }
 0x127   :  { %s1212_s24 = sshll.u32 %s1401_s2, 4  ;;  %s1213_s24 = int_to_ptr.vmem [resolvable:$true] %s1212_s24 }
 0x128   :  { %v700_v0 = vsel %vm424_vm6, %v699_v63, %v695_v22  ;;  %v1275_v63 = vld [vmem:[#allocation2 + $0x48] sm:$0xff]  ;;  %s1369_s25 = scalar_lea.vmem %s1213_s24, 8192  ;;  %p1374_p11 = scmp.lt.s32.totalorder %s1213_s24, %s1213_s24 }
 0x129   :  { %v705_v9 = vsel %vm431_vm7, %v704_v30, %v700_v0  ;;  %p1370_p10 = scmp.ne.s32.totalorder %s1213_s24, %s1369_s25  ;;  %p1375_p12 = scmp.lt.s32.totalorder %s1369_s25, %s1369_s25 }
 0x12a   :  { %v719_v31 = vsel %vm718_vm14, %v705_v9, %v717_v35  ;;  %v1277_v9 = vld [vmem:[#allocation2 + $0x58] sm:$0xff] }
 0x12b   :  { %1254 = vmatmul.mubr.msk.f32.vlgmr.msra.gmra.mxu0 %vm720_vm15, %v719_v31  ;;  %v1278_v31 = vld [vmem:[#allocation2 + $0x70] sm:$0xff]  ;;  %p1376_p13 = por %p1375_p12, %p1374_p11 }
 0x12d   :  { %p1377_p0 = pnand %p1376_p13, %p1370_p10 }
 0x1eb   :  { %v789_v6 = vpop.f32.mrf.mxu0 }
 0x1ec   :  { %v790_v32 = vadd.f32 %v1225_v5, %v789_v6 }
 0x1ed   :  { %v1255_v42 = vpop.f32.mrf.mxu0 }
 0x1ee   :  { %v1227_v43 = vmul.f32 -1.442695, %v790_v32  ;;  %v1279_v42 = vld [vmem:[#allocation2 + $0x68] sm:$0xff] }
 0x1f0   :  { %1263 = vpow2.f32 %v1227_v43 }
 0x1fd   :  { %v1264_v44 = vpop.eup %1263 }
 0x1fe   :  { %v796_v50 = vadd.f32 1.0, %v1264_v44  ;;  %v1280_v44 = vld [vmem:[#allocation2 + $0x80] sm:$0xff] }
 0x200   :  { %1265 = vrcp.f32 %v796_v50 }
 0x20d   :  { %v1725_v45 = vpop.eup %1265 }
 0x20e   :  { %v802_v37 = vrot.slane %v1725_v45, %v801_v34  ;;  %v837_v52 = vrot.slane %v1725_v45, %v836_v13  ;;  %v872_v61 = vrot.slane %v1725_v45, %v871_v36  ;;  %v907_v28 = vrot.slane %v1725_v45, %v906_v57 }
 0x20f   :  { %v942_v11 = vrot.slane %v1725_v45, %v941_v41  ;;  %v977_v23 = vrot.slane %v1725_v45, %v976_v53  ;;  %v1012_v55 = vrot.slane %v1725_v45, %v1011_v49  ;;  %v1047_v33 = vrot.slane %v1725_v45, %v1046_v54 }
 0x210   :  { %808 = vbcast.lane.b32.xlu1 %v802_v37, 264  ;;  %804 = vbcast.lane.b32.xlu0 %v802_v37, 256 }
 0x214   :  { %812 = vbcast.lane.b32.xlu1 %v802_v37, 272  ;;  %820 = vbcast.lane.b32.xlu0 %v802_v37, 288 }
 0x218   :  { %816 = vbcast.lane.b32.xlu1 %v802_v37, 280  ;;  %828 = vbcast.lane.b32.xlu0 %v802_v37, 304 }
 0x21c   :  { %824 = vbcast.lane.b32.xlu1 %v802_v37, 296  ;;  %839 = vbcast.lane.b32.xlu0 %v837_v52, 256 }
 0x220   :  { %832 = vbcast.lane.b32.xlu1 %v802_v37, 312  ;;  %847 = vbcast.lane.b32.xlu0 %v837_v52, 272  ;;  %v1281_v37 = vld [vmem:[#allocation2 + $0x78] sm:$0xff] }
 0x224   :  { %843 = vbcast.lane.b32.xlu1 %v837_v52, 264  ;;  %855 = vbcast.lane.b32.xlu0 %v837_v52, 288 }
 0x228   :  { %851 = vbcast.lane.b32.xlu1 %v837_v52, 280  ;;  %863 = vbcast.lane.b32.xlu0 %v837_v52, 304 }
 0x22c   :  { %859 = vbcast.lane.b32.xlu1 %v837_v52, 296  ;;  %874 = vbcast.lane.b32.xlu0 %v872_v61, 256 }
 0x230   :  { %867 = vbcast.lane.b32.xlu1 %v837_v52, 312  ;;  %882 = vbcast.lane.b32.xlu0 %v872_v61, 272  ;;  %v1282_v52 = vld [vmem:[#allocation2 + $0x90] sm:$0xff] }
 0x234   :  { %878 = vbcast.lane.b32.xlu1 %v872_v61, 264  ;;  %890 = vbcast.lane.b32.xlu0 %v872_v61, 288 }
 0x238   :  { %886 = vbcast.lane.b32.xlu1 %v872_v61, 280  ;;  %898 = vbcast.lane.b32.xlu0 %v872_v61, 304 }
 0x23c   :  { %894 = vbcast.lane.b32.xlu1 %v872_v61, 296  ;;  %909 = vbcast.lane.b32.xlu0 %v907_v28, 256 }
 0x240   :  { %902 = vbcast.lane.b32.xlu1 %v872_v61, 312  ;;  %917 = vbcast.lane.b32.xlu0 %v907_v28, 272 }
 0x244   :  { %913 = vbcast.lane.b32.xlu1 %v907_v28, 264  ;;  %925 = vbcast.lane.b32.xlu0 %v907_v28, 288 }
 0x248   :  { %921 = vbcast.lane.b32.xlu1 %v907_v28, 280  ;;  %933 = vbcast.lane.b32.xlu0 %v907_v28, 304 }
 0x24c   :  { %929 = vbcast.lane.b32.xlu1 %v907_v28, 296  ;;  %944 = vbcast.lane.b32.xlu0 %v942_v11, 256 }
 0x250   :  { %937 = vbcast.lane.b32.xlu1 %v907_v28, 312  ;;  %952 = vbcast.lane.b32.xlu0 %v942_v11, 272  ;;  %v1283_v28 = vld [vmem:[#allocation2 + $0x88] sm:$0xff] }
 0x254   :  { %948 = vbcast.lane.b32.xlu1 %v942_v11, 264  ;;  %960 = vbcast.lane.b32.xlu0 %v942_v11, 288 }
 0x258   :  { %956 = vbcast.lane.b32.xlu1 %v942_v11, 280  ;;  %968 = vbcast.lane.b32.xlu0 %v942_v11, 304 }
 0x25c   :  { %964 = vbcast.lane.b32.xlu1 %v942_v11, 296  ;;  %979 = vbcast.lane.b32.xlu0 %v977_v23, 256 }
 0x260   :  { %972 = vbcast.lane.b32.xlu1 %v942_v11, 312  ;;  %987 = vbcast.lane.b32.xlu0 %v977_v23, 272  ;;  %v1284_v11 = vld [vmem:[#allocation2 + $0xa0] sm:$0xff] }
 0x264   :  { %983 = vbcast.lane.b32.xlu1 %v977_v23, 264  ;;  %995 = vbcast.lane.b32.xlu0 %v977_v23, 288 }
 0x268   :  { %991 = vbcast.lane.b32.xlu1 %v977_v23, 280  ;;  %1003 = vbcast.lane.b32.xlu0 %v977_v23, 304 }
 0x26c   :  { %999 = vbcast.lane.b32.xlu1 %v977_v23, 296  ;;  %1014 = vbcast.lane.b32.xlu0 %v1012_v55, 256 }
 0x270   :  { %1007 = vbcast.lane.b32.xlu1 %v977_v23, 312  ;;  %1022 = vbcast.lane.b32.xlu0 %v1012_v55, 272 }
 0x274   :  { %1018 = vbcast.lane.b32.xlu1 %v1012_v55, 264  ;;  %1030 = vbcast.lane.b32.xlu0 %v1012_v55, 288 }
 0x278   :  { %1026 = vbcast.lane.b32.xlu1 %v1012_v55, 280  ;;  %1038 = vbcast.lane.b32.xlu0 %v1012_v55, 304 }
 0x27c   :  { %1034 = vbcast.lane.b32.xlu1 %v1012_v55, 296  ;;  %1049 = vbcast.lane.b32.xlu0 %v1047_v33, 256 }
 0x280   :  { %1042 = vbcast.lane.b32.xlu1 %v1012_v55, 312  ;;  %1057 = vbcast.lane.b32.xlu0 %v1047_v33, 272  ;;  %v1285_v55 = vld [vmem:[#allocation2 + $0x98] sm:$0xff] }
 0x282   :  { %v809_v56 = vpop.permute.xlu1 %808  ;;  %v805_v38 = vpop.permute.xlu0 %804 }
 0x283   :  { %v1080_v16 = vmul.f32 %v1267_v4, %v809_v56  ;;  %v1079_v15 = vmul.f32 %v1268_v62, %v805_v38 }
 0x284   :  { %1053 = vbcast.lane.b32.xlu1 %v1047_v33, 264  ;;  %1065 = vbcast.lane.b32.xlu0 %v1047_v33, 288 }
 0x285   :  { %1144 = vst [vmem:[#allocation7 + $0x8] sm:$0xff] %v1080_v16  ;;  %1143 = vst [vmem:[#allocation7] sm:$0xff] %v1079_v15  ;;  %v1287_v16 = vld [vmem:[#allocation2 + $0xa8] sm:$0xff]  ;;  %v1288_v15 = vld [vmem:[#allocation2 + $0xc0] sm:$0xff] }
 0x286   :  { %v813_v14 = vpop.permute.xlu1 %812  ;;  %v821_v51 = vpop.permute.xlu0 %820 }
 0x287   :  { %v1081_v60 = vmul.f32 %v1269_v17, %v813_v14  ;;  %v1083_v40 = vmul.f32 %v1270_v39, %v821_v51 }
 0x288   :  { %1061 = vbcast.lane.b32.xlu1 %v1047_v33, 280  ;;  %1073 = vbcast.lane.b32.xlu0 %v1047_v33, 304 }
 0x289   :  { %1145 = vst [vmem:[#allocation7 + $0x10] sm:$0xff] %v1081_v60  ;;  %1147 = vst [vmem:[#allocation7 + $0x20] sm:$0xff] %v1083_v40  ;;  %v1289_v60 = vld [vmem:[#allocation2 + $0xb8] sm:$0xff]  ;;  %v1290_v40 = vld [vmem:[#allocation2 + $0xd0] sm:$0xff] }
 0x28a   :  { %v817_v3 = vpop.permute.xlu1 %816  ;;  %v829_v48 = vpop.permute.xlu0 %828 }
 0x28b   :  { %v1082_v12 = vmul.f32 %v1271_v18, %v817_v3  ;;  %v1085_v24 = vmul.f32 %v829_v48, %v1434_v27 }
 0x28c   :  { %1069 = vbcast.lane.b32.xlu1 %v1047_v33, 296 }
 0x28d   :  { %1146 = vst [vmem:[#allocation7 + $0x18] sm:$0xff] %v1082_v12  ;;  %1149 = vst [vmem:[#allocation7 + $0x30] sm:$0xff] %v1085_v24  ;;  %v1291_v12 = vld [vmem:[#allocation2 + $0xc8] sm:$0xff] }
 0x28e   :  { %v825_v2 = vpop.permute.xlu1 %824  ;;  %v840_v19 = vpop.permute.xlu0 %839 }
 0x28f   :  { %v1084_v29 = vmul.f32 %v1272_v10, %v825_v2  ;;  %v1087_v21 = vmul.f32 %v1273_v20, %v840_v19  ;;  %v1292_v2 = vld [vmem:[#allocation2 + $0xe0] sm:$0xff]  ;;  %v1293_v20 = vld [vmem:[#allocation2 + $0xd8] sm:$0xff] }
 0x290   :  { %1077 = vbcast.lane.b32.xlu1 %v1047_v33, 312  ;;  %v1286_v33 = vld [vmem:[#allocation2 + $0xb0] sm:$0xff] }
 0x291   :  { %1148 = vst [vmem:[#allocation7 + $0x28] sm:$0xff] %v1084_v29  ;;  %1151 = vst [vmem:[#allocation7 + $0x40] sm:$0xff] %v1087_v21 }
 0x292   :  { %v833_v46 = vpop.permute.xlu1 %832  ;;  %v848_v7 = vpop.permute.xlu0 %847 }
 0x293   :  { %v1086_v26 = vmul.f32 %v833_v46, %v1756_v59  ;;  %v1089_v25 = vmul.f32 %v1274_v47, %v848_v7  ;;  %v1294_v46 = vld [vmem:[#allocation2 + $0xf0] sm:$0xff]  ;;  %v1295_v47 = vld [vmem:[#allocation2 + $0xe8] sm:$0xff] }
 0x295   :  { %1150 = vst [vmem:[#allocation7 + $0x38] sm:$0xff] %v1086_v26  ;;  %1153 = vst [vmem:[#allocation7 + $0x50] sm:$0xff] %v1089_v25 }
 0x296   :  { %v844_v27 = vpop.permute.xlu1 %843  ;;  %v856_v1 = vpop.permute.xlu0 %855 }
 0x297   :  { %v1088_v30 = vmul.f32 %v1275_v63, %v844_v27  ;;  %v1091_v22 = vmul.f32 %v1276_v58, %v856_v1  ;;  %v1296_v27 = vld [vmem:[#allocation2 + $0x100] sm:$0xff]  ;;  %v1297_v58 = vld [vmem:[#allocation2 + $0xf8] sm:$0xff] }
 0x299   :  { %1152 = vst [vmem:[#allocation7 + $0x48] sm:$0xff] %v1088_v30  ;;  %1155 = vst [vmem:[#allocation7 + $0x60] sm:$0xff] %v1091_v22 }
 0x29a   :  { %v852_v0 = vpop.permute.xlu1 %851  ;;  %v864_v8 = vpop.permute.xlu0 %863 }
 0x29b   :  { %v1090_v35 = vmul.f32 %v1277_v9, %v852_v0  ;;  %v1093_v5 = vmul.f32 %v1278_v31, %v864_v8  ;;  %v1298_v0 = vld [vmem:[#allocation2 + $0x110] sm:$0xff]  ;;  %v1299_v31 = vld [vmem:[#allocation2 + $0x108] sm:$0xff] }
 0x29d   :  { %1154 = vst [vmem:[#allocation7 + $0x58] sm:$0xff] %v1090_v35  ;;  %1157 = vst [vmem:[#allocation7 + $0x70] sm:$0xff] %v1093_v5 }
 0x29e   :  { %v860_v6 = vpop.permute.xlu1 %859  ;;  %v875_v32 = vpop.permute.xlu0 %874 }
 0x29f   :  { %v1092_v43 = vmul.f32 %v1279_v42, %v860_v6  ;;  %v1095_v50 = vmul.f32 %v1280_v44, %v875_v32  ;;  %v1300_v6 = vld [vmem:[#allocation2 + $0x120] sm:$0xff]  ;;  %v1301_v44 = vld [vmem:[#allocation2 + $0x118] sm:$0xff] }
 0x2a1   :  { %1156 = vst [vmem:[#allocation7 + $0x68] sm:$0xff] %v1092_v43  ;;  %1159 = vst [vmem:[#allocation7 + $0x80] sm:$0xff] %v1095_v50 }
 0x2a2   :  { %v868_v34 = vpop.permute.xlu1 %867  ;;  %v883_v45 = vpop.permute.xlu0 %882 }
 0x2a3   :  { %v1094_v13 = vmul.f32 %v1281_v37, %v868_v34  ;;  %v1097_v36 = vmul.f32 %v1282_v52, %v883_v45  ;;  %v1302_v34 = vld [vmem:[#allocation2 + $0x130] sm:$0xff]  ;;  %v1303_v52 = vld [vmem:[#allocation2 + $0x128] sm:$0xff] }
 0x2a5   :  { %1158 = vst [vmem:[#allocation7 + $0x78] sm:$0xff] %v1094_v13  ;;  %1161 = vst [vmem:[#allocation7 + $0x90] sm:$0xff] %v1097_v36 }
 0x2a6   :  { %v879_v61 = vpop.permute.xlu1 %878  ;;  %v891_v57 = vpop.permute.xlu0 %890 }
 0x2a7   :  { %v1096_v41 = vmul.f32 %v1283_v28, %v879_v61  ;;  %v1099_v53 = vmul.f32 %v1284_v11, %v891_v57  ;;  %v1304_v61 = vld [vmem:[#allocation2 + $0x140] sm:$0xff]  ;;  %v1305_v11 = vld [vmem:[#allocation2 + $0x138] sm:$0xff] }
 0x2a9   :  { %1160 = vst [vmem:[#allocation7 + $0x88] sm:$0xff] %v1096_v41  ;;  %1163 = vst [vmem:[#allocation7 + $0xa0] sm:$0xff] %v1099_v53 }
 0x2aa   :  { %v887_v23 = vpop.permute.xlu1 %886  ;;  %v899_v49 = vpop.permute.xlu0 %898 }
 0x2ab   :  { %v1098_v54 = vmul.f32 %v1285_v55, %v887_v23  ;;  %v1101_v56 = vmul.f32 %v1286_v33, %v899_v49  ;;  %v1306_v23 = vld [vmem:[#allocation2 + $0x150] sm:$0xff]  ;;  %v1307_v33 = vld [vmem:[#allocation2 + $0x148] sm:$0xff] }
 0x2ad   :  { %1162 = vst [vmem:[#allocation7 + $0x98] sm:$0xff] %v1098_v54  ;;  %1165 = vst [vmem:[#allocation7 + $0xb0] sm:$0xff] %v1101_v56 }
 0x2ae   :  { %v895_v38 = vpop.permute.xlu1 %894  ;;  %v910_v4 = vpop.permute.xlu0 %909 }
 0x2af   :  { %v1100_v62 = vmul.f32 %v1287_v16, %v895_v38  ;;  %v1103_v14 = vmul.f32 %v1288_v15, %v910_v4  ;;  %v1308_v38 = vld [vmem:[#allocation2 + $0x160] sm:$0xff]  ;;  %v1309_v15 = vld [vmem:[#allocation2 + $0x158] sm:$0xff] }
 0x2b1   :  { %1164 = vst [vmem:[#allocation7 + $0xa8] sm:$0xff] %v1100_v62  ;;  %1167 = vst [vmem:[#allocation7 + $0xc0] sm:$0xff] %v1103_v14 }
 0x2b2   :  { %v903_v51 = vpop.permute.xlu1 %902  ;;  %v918_v17 = vpop.permute.xlu0 %917 }
 0x2b3   :  { %v1102_v39 = vmul.f32 %v1289_v60, %v903_v51  ;;  %v1105_v3 = vmul.f32 %v1290_v40, %v918_v17  ;;  %v1310_v51 = vld [vmem:[#allocation2 + $0x170] sm:$0xff]  ;;  %v1311_v40 = vld [vmem:[#allocation2 + $0x168] sm:$0xff] }
 0x2b5   :  { %1166 = vst [vmem:[#allocation7 + $0xb8] sm:$0xff] %v1102_v39  ;;  %1169 = vst [vmem:[#allocation7 + $0xd0] sm:$0xff] %v1105_v3 }
 0x2b6   :  { %v914_v48 = vpop.permute.xlu1 %913  ;;  %v926_v18 = vpop.permute.xlu0 %925 }
 0x2b7   :  { %v1104_v24 = vmul.f32 %v1291_v12, %v914_v48  ;;  %v1107_v19 = vmul.f32 %v1292_v2, %v926_v18  ;;  %v1312_v48 = vld [vmem:[#allocation2 + $0x180] sm:$0xff]  ;;  %v1313_v2 = vld [vmem:[#allocation2 + $0x178] sm:$0xff] }
 0x2b9   :  { %1168 = vst [vmem:[#allocation7 + $0xc8] sm:$0xff] %v1104_v24  ;;  %1171 = vst [vmem:[#allocation7 + $0xe0] sm:$0xff] %v1107_v19 }
 0x2ba   :  { %v922_v10 = vpop.permute.xlu1 %921  ;;  %v934_v29 = vpop.permute.xlu0 %933 }
 0x2bb   :  { %v1106_v21 = vmul.f32 %v1293_v20, %v922_v10  ;;  %v1109_v7 = vmul.f32 %v1294_v46, %v934_v29  ;;  %v1314_v10 = vld [vmem:[#allocation2 + $0x190] sm:$0xff]  ;;  %v1315_v46 = vld [vmem:[#allocation2 + $0x188] sm:$0xff] }
 0x2bd   :  { %1170 = vst [vmem:[#allocation7 + $0xd8] sm:$0xff] %v1106_v21  ;;  %1173 = vst [vmem:[#allocation7 + $0xf0] sm:$0xff] %v1109_v7 }
 0x2be   :  { %v930_v59 = vpop.permute.xlu1 %929  ;;  %v945_v26 = vpop.permute.xlu0 %944 }
 0x2bf   :  { %v1108_v25 = vmul.f32 %v1295_v47, %v930_v59  ;;  %v1111_v1 = vmul.f32 %v1296_v27, %v945_v26  ;;  %v1316_v59 = vld [vmem:[#allocation2 + $0x1a0] sm:$0xff]  ;;  %v1317_v27 = vld [vmem:[#allocation2 + $0x198] sm:$0xff] }
 0x2c1   :  { %1172 = vst [vmem:[#allocation7 + $0xe8] sm:$0xff] %v1108_v25  ;;  %1175 = vst [vmem:[#allocation7 + $0x100] sm:$0xff] %v1111_v1 }
 0x2c2   :  { %v938_v63 = vpop.permute.xlu1 %937  ;;  %v953_v30 = vpop.permute.xlu0 %952 }
 0x2c3   :  { %v1110_v22 = vmul.f32 %v1297_v58, %v938_v63  ;;  %v1113_v8 = vmul.f32 %v1298_v0, %v953_v30  ;;  %v1318_v63 = vld [vmem:[#allocation2 + $0x1b0] sm:$0xff]  ;;  %v1319_v0 = vld [vmem:[#allocation2 + $0x1a8] sm:$0xff] }
 0x2c5   :  { %1174 = vst [vmem:[#allocation7 + $0xf8] sm:$0xff] %v1110_v22  ;;  %1177 = vst [vmem:[#allocation7 + $0x110] sm:$0xff] %v1113_v8 }
 0x2c6   :  { %v949_v9 = vpop.permute.xlu1 %948  ;;  %v961_v35 = vpop.permute.xlu0 %960 }
 0x2c7   :  { %v1112_v5 = vmul.f32 %v1299_v31, %v949_v9  ;;  %v1115_v32 = vmul.f32 %v1300_v6, %v961_v35  ;;  %v1320_v9 = vld [vmem:[#allocation2 + $0x1c0] sm:$0xff]  ;;  %v1321_v6 = vld [vmem:[#allocation2 + $0x1b8] sm:$0xff] }
 0x2c9   :  { %1176 = vst [vmem:[#allocation7 + $0x108] sm:$0xff] %v1112_v5  ;;  %1179 = vst [vmem:[#allocation7 + $0x120] sm:$0xff] %v1115_v32 }
 0x2ca   :  { %v957_v42 = vpop.permute.xlu1 %956  ;;  %v969_v43 = vpop.permute.xlu0 %968 }
 0x2cb   :  { %v1114_v50 = vmul.f32 %v1301_v44, %v957_v42  ;;  %v1117_v45 = vmul.f32 %v1302_v34, %v969_v43  ;;  %v1322_v42 = vld [vmem:[#allocation2 + $0x1d0] sm:$0xff]  ;;  %v1323_v34 = vld [vmem:[#allocation2 + $0x1c8] sm:$0xff] }
 0x2cd   :  { %1178 = vst [vmem:[#allocation7 + $0x118] sm:$0xff] %v1114_v50  ;;  %1181 = vst [vmem:[#allocation7 + $0x130] sm:$0xff] %v1117_v45 }
 0x2ce   :  { %v965_v37 = vpop.permute.xlu1 %964  ;;  %v980_v13 = vpop.permute.xlu0 %979 }
 0x2cf   :  { %v1116_v36 = vmul.f32 %v1303_v52, %v965_v37  ;;  %v1119_v57 = vmul.f32 %v1304_v61, %v980_v13  ;;  %v1324_v37 = vld [vmem:[#allocation2 + $0x1e0] sm:$0xff]  ;;  %v1325_v61 = vld [vmem:[#allocation2 + $0x1d8] sm:$0xff] }
 0x2d1   :  { %1180 = vst [vmem:[#allocation7 + $0x128] sm:$0xff] %v1116_v36  ;;  %1183 = vst [vmem:[#allocation7 + $0x140] sm:$0xff] %v1119_v57 }
 0x2d2   :  { %v973_v28 = vpop.permute.xlu1 %972  ;;  %v988_v41 = vpop.permute.xlu0 %987 }
 0x2d3   :  { %v1118_v53 = vmul.f32 %v1305_v11, %v973_v28  ;;  %v1121_v49 = vmul.f32 %v1306_v23, %v988_v41  ;;  %v1326_v28 = vld [vmem:[#allocation2 + $0x1f0] sm:$0xff] }
 0x2d5   :  { %1182 = vst [vmem:[#allocation7 + $0x138] sm:$0xff] %v1118_v53  ;;  %1185 = vst [vmem:[#allocation7 + $0x150] sm:$0xff] %v1121_v49  ;;  %v1327_v53 = vld [vmem:[#allocation2 + $0x1e8] sm:$0xff] }
 0x2d6   :  { %v984_v55 = vpop.permute.xlu1 %983  ;;  %v996_v54 = vpop.permute.xlu0 %995 }
 0x2d7   :  { %v1120_v56 = vmul.f32 %v1307_v33, %v984_v55  ;;  %v1123_v4 = vmul.f32 %v1308_v38, %v996_v54  ;;  %v1328_v55 = vld [vmem:[#allocation2 + $0x1f8] sm:$0xff] }
 0x2d9   :  { %1184 = vst [vmem:[#allocation7 + $0x148] sm:$0xff] %v1120_v56  ;;  %1187 = vst [vmem:[#allocation7 + $0x160] sm:$0xff] %v1123_v4 }
 0x2da   :  { %v992_v16 = vpop.permute.xlu1 %991  ;;  %v1004_v62 = vpop.permute.xlu0 %1003 }
 0x2db   :  { %v1122_v14 = vmul.f32 %v1309_v15, %v992_v16  ;;  %v1125_v17 = vmul.f32 %v1310_v51, %v1004_v62 }
 0x2dd   :  { %1186 = vst [vmem:[#allocation7 + $0x158] sm:$0xff] %v1122_v14  ;;  %1189 = vst [vmem:[#allocation7 + $0x170] sm:$0xff] %v1125_v17 }
 0x2de   :  { %v1000_v60 = vpop.permute.xlu1 %999  ;;  %v1015_v39 = vpop.permute.xlu0 %1014 }
 0x2df   :  { %v1124_v3 = vmul.f32 %v1311_v40, %v1000_v60  ;;  %v1127_v18 = vmul.f32 %v1312_v48, %v1015_v39 }
 0x2e1   :  { %1188 = vst [vmem:[#allocation7 + $0x168] sm:$0xff] %v1124_v3  ;;  %1191 = vst [vmem:[#allocation7 + $0x180] sm:$0xff] %v1127_v18 }
 0x2e2   :  { %v1008_v12 = vpop.permute.xlu1 %1007  ;;  %v1023_v24 = vpop.permute.xlu0 %1022 }
 0x2e3   :  { %v1126_v19 = vmul.f32 %v1313_v2, %v1008_v12  ;;  %v1129_v29 = vmul.f32 %v1314_v10, %v1023_v24 }
 0x2e5   :  { %1190 = vst [vmem:[#allocation7 + $0x178] sm:$0xff] %v1126_v19  ;;  %1193 = vst [vmem:[#allocation7 + $0x190] sm:$0xff] %v1129_v29 }
 0x2e6   :  { %v1019_v20 = vpop.permute.xlu1 %1018  ;;  %v1031_v21 = vpop.permute.xlu0 %1030 }
 0x2e7   :  { %v1128_v7 = vmul.f32 %v1315_v46, %v1019_v20  ;;  %v1131_v26 = vmul.f32 %v1316_v59, %v1031_v21 }
 0x2e9   :  { %1192 = vst [vmem:[#allocation7 + $0x188] sm:$0xff] %v1128_v7  ;;  %1195 = vst [vmem:[#allocation7 + $0x1a0] sm:$0xff] %v1131_v26 }
 0x2ea   :  { %v1027_v47 = vpop.permute.xlu1 %1026  ;;  %v1039_v25 = vpop.permute.xlu0 %1038 }
 0x2eb   :  { %v1130_v1 = vmul.f32 %v1317_v27, %v1027_v47  ;;  %v1133_v30 = vmul.f32 %v1318_v63, %v1039_v25 }
 0x2ed   :  { %1194 = vst [vmem:[#allocation7 + $0x198] sm:$0xff] %v1130_v1  ;;  %1197 = vst [vmem:[#allocation7 + $0x1b0] sm:$0xff] %v1133_v30 }
 0x2ee   :  { %v1035_v58 = vpop.permute.xlu1 %1034  ;;  %v1050_v22 = vpop.permute.xlu0 %1049 }
 0x2ef   :  { %v1132_v8 = vmul.f32 %v1319_v0, %v1035_v58  ;;  %v1135_v35 = vmul.f32 %v1320_v9, %v1050_v22 }
 0x2f1   :  { %1196 = vst [vmem:[#allocation7 + $0x1a8] sm:$0xff] %v1132_v8  ;;  %1199 = vst [vmem:[#allocation7 + $0x1c0] sm:$0xff] %v1135_v35 }
 0x2f2   :  { %v1043_v31 = vpop.permute.xlu1 %1042  ;;  %v1058_v5 = vpop.permute.xlu0 %1057 }
 0x2f3   :  { %v1134_v32 = vmul.f32 %v1321_v6, %v1043_v31  ;;  %v1137_v43 = vmul.f32 %v1322_v42, %v1058_v5 }
 0x2f5   :  { %1198 = vst [vmem:[#allocation7 + $0x1b8] sm:$0xff] %v1134_v32  ;;  %1201 = vst [vmem:[#allocation7 + $0x1d0] sm:$0xff] %v1137_v43 }
 0x2f6   :  { %v1054_v44 = vpop.permute.xlu1 %1053  ;;  %v1066_v50 = vpop.permute.xlu0 %1065 }
 0x2f7   :  { %v1136_v45 = vmul.f32 %v1323_v34, %v1054_v44  ;;  %v1139_v13 = vmul.f32 %v1324_v37, %v1066_v50 }
 0x2f9   :  { %1200 = vst [vmem:[#allocation7 + $0x1c8] sm:$0xff] %v1136_v45  ;;  %1203 = vst [vmem:[#allocation7 + $0x1e0] sm:$0xff] %v1139_v13 }
 0x2fa   :  { %v1062_v52 = vpop.permute.xlu1 %1061  ;;  %v1074_v36 = vpop.permute.xlu0 %1073 }
 0x2fb   :  { %v1138_v57 = vmul.f32 %v1325_v61, %v1062_v52  ;;  %v1141_v41 = vmul.f32 %v1326_v28, %v1074_v36 }
 0x2fd   :  { %1202 = vst [vmem:[#allocation7 + $0x1d8] sm:$0xff] %v1138_v57  ;;  %1205 = vst [vmem:[#allocation7 + $0x1f0] sm:$0xff] %v1141_v41 }
 0x2fe   :  { %v1070_v11 = vpop.permute.xlu1 %1069 }
 0x2ff   :  { %v1140_v23 = vmul.f32 %v1327_v53, %v1070_v11 }
 0x301   :  { %1204 = vst [vmem:[#allocation7 + $0x1e8] sm:$0xff] %v1140_v23 }
 0x302   :  { %v1078_v49 = vpop.permute.xlu1 %1077 }
 0x303   :  { %v1142_v54 = vmul.f32 %v1328_v55, %v1078_v49 }
 0x305   :  { %1206 = vst [vmem:[#allocation7 + $0x1f8] sm:$0xff] %v1142_v54 }
 0x306   :  { %1380 = shalt.err (!%p1377_p0)
}
 0x307   :  { %1218 = dma.vmem_to_hbm [thread:$0]  %s1213_s24, 8192, %s1753_s3, [#allocation4], %s1396_s15, %s1396_s15, %s1397_s16  }
 0x308   :  { %1393 = dma.done.wait [#allocation4], 8192  }
 0x309   :  { %1394 = vsyncadd [#allocation4], 4294959104 }
 0x30a   :  { %1222 = vsyncpa [#allocation3], 1 }
 0x30b   :  { %1223 = vsyncpa [#allocation6], 1 }
 0x30c   :  { %1224 = vsyncpa [#allocation4], 1 }

</bundles_post_ra>
